<compile_context>
chip_gen: v6e
topology: v6e:2x2x1
jax: 0.10.0
libtpu: 0.0.40
codegen_flags: <defaults>
</compile_context>

<pallas_src>
from math import gcd
from functools import partial

import jax
import jax.numpy as jnp
from jax.experimental import pallas as pl
from jax.experimental.pallas import tpu as pltpu

EPS = 1e-5  # PyTorch GroupNorm default


def _round_up(x, m):
    return ((x + m - 1) // m) * m


def _pick_divisor_tile(dim, target, unit):
    """Largest multiple of `unit` that divides `dim` and is <= target; else `dim`."""
    if dim <= target or dim % unit != 0:
        return dim
    t = (target // unit) * unit
    while t >= unit:
        if dim % t == 0:
            return t
        t -= unit
    return dim


def _fused_linear_gn_relu_kernel(x_ref, w_ref, gmat_ref, gtg_ref, beta_ref,
                                 o_ref, acc_ref, *, act: bool):
    k = pl.program_id(2)

    # bf16 x bf16 -> f32 on the MXU.  x is cast in-kernel (VPU cast hides under the
    # MXU) so the wrapper never materializes a bf16 copy of x in HBM.
    prod = jnp.dot(x_ref[...].astype(jnp.bfloat16), w_ref[...],
                   preferred_element_type=jnp.float32)

    @pl.when(k == 0)
    def _init():
        acc_ref[...] = prod          # first partial product: plain store, no zero-fill

    @pl.when(k != 0)
    def _accum():
        acc_ref[...] += prod

    @pl.when(k == pl.num_programs(2) - 1)
    def _finalize():
        y = acc_ref[...]                          # (tb, tn) f32 - whole groups only
        tb = y.shape[0]
        gmat = gmat_ref[...]                      # (tn, G), one-hot / group_size
        # Per-group stats via MXU matmuls (f32).  Groups outside this n_out tile get
        # zero columns in gmat and zero rows in gtg, so they contribute nothing.
        mean_g = jnp.dot(y, gmat, preferred_element_type=jnp.float32)        # (tb, G)
        mean2_g = jnp.dot(y * y, gmat, preferred_element_type=jnp.float32)   # (tb, G)
        var_g = jnp.maximum(mean2_g - mean_g * mean_g, 0.0)  # clamp: avoid rsqrt NaN
        inv_std_g = jax.lax.rsqrt(var_g + EPS)                               # (tb, G)

        # Single broadcast matmul for both scale and mean*inv_std (stacked on batch),
        # gamma already folded into gtg[g, c].
        stats = jnp.concatenate([inv_std_g, mean_g * inv_std_g], axis=0)     # (2tb, G)
        bcast = jnp.dot(stats, gtg_ref[...],
                        preferred_element_type=jnp.float32)                  # (2tb, tn)
        scale = bcast[:tb]
        shift = beta_ref[...] - bcast[tb:]

        out = y * scale + shift
        if act:
            out = jnp.maximum(out, 0.0)
        o_ref[...] = out.astype(o_ref.dtype)


def prepare_params(weight, gamma, beta, *, ng=32):
    """One-time (per-model) param prep, hoisted out of the hot path.

    weight: (n_out, n_in) PyTorch layout; gamma/beta: (n_out,).
    Returns (w_t_bf16 padded to K%128==0, gmat_scaled, gmat_t_gamma, beta_row, groups).
    """
    n_out, n_in = weight.shape
    groups = gcd(ng, n_out)
    assert n_out % groups == 0
    gsize = n_out // groups

    ch = jnp.arange(n_out)
    onehot = (ch[:, None] // gsize == jnp.arange(groups)[None, :]).astype(jnp.float32)
    gmat_scaled = onehot / float(gsize)                           # (n_out, G)
    gmat_t_gamma = onehot.T * gamma[None, :].astype(jnp.float32)  # (G, n_out)

    w_t = weight.T.astype(jnp.bfloat16)                           # (n_in, n_out) bf16
    n_in_pad = _round_up(n_in, 128)
    if n_in_pad != n_in:
        w_t = jnp.pad(w_t, ((0, n_in_pad - n_in), (0, 0)))        # zero rows: exact
    beta_row = beta.reshape(1, n_out).astype(jnp.float32)
    return w_t, gmat_scaled, gmat_t_gamma, beta_row, groups


def linear_gn_relu(x, w_t, gmat_scaled, gmat_t_gamma, beta_row, *, act=True,
                   out_dtype=jnp.bfloat16):
    """x: (B, n_in); remaining args from prepare_params(). Returns (B, n_out)."""
    B, n_in = x.shape
    n_in_pad, n_out = w_t.shape
    G = gmat_scaled.shape[1]
    gsize = n_out // G

    # --- n_out tile: whole GroupNorm groups, lane-dense (multiple of 128). ---------
    unit_n = (gsize * 128) // gcd(gsize, 128)     # lcm(group_size, 128)
    tn = _pick_divisor_tile(n_out, 512, unit_n)

    # --- K tile: multiple of 128 dividing the (pre-padded) n_in. --------------------
    tk = _pick_divisor_tile(n_in_pad, 512, 128)

    # --- batch tile: multiple of 16 (bf16 sublane packing), capped at 256. ----------
    tb = 8 if B <= 8 else min(256, _round_up(B, 16))
    if n_out // tn == 1 and 32 <= B <= 256:
        # Guarantee >=2 "parallel" grid steps so v7x's second TensorCore isn't idle.
        tb = max(16, _round_up((B + 1) // 2, 16))

    B_pad = _round_up(B, tb)
    pad_b = B_pad - B
    pad_k = n_in_pad - n_in
    if pad_b or pad_k:
        x = jnp.pad(x, ((0, pad_b), (0, pad_k)))  # zero rows/cols: exact for matmul

    grid = (B_pad // tb, n_out // tn, n_in_pad // tk)
    n_i, n_j, n_k = grid

    # --- VMEM budget from the actual tile footprint (+ headroom). -------------------
    x_it = jnp.dtype(x.dtype).itemsize
    o_it = jnp.dtype(out_dtype).itemsize
    vmem_bytes = (2 * tb * tk * x_it              # x tiles (double-buffered)
                  + 2 * tk * tn * 2               # w^T bf16 tiles
                  + 2 * tb * tn * o_it            # output tiles
                  + tb * tn * 4                   # f32 accumulator
                  + 2 * (tn * G + G * tn + tn) * 4  # small GN params
                  + 8 * tb * tn * 4)              # epilogue temporaries headroom
    vmem_limit = min(64 * 1024 * 1024,
                     max(16 * 1024 * 1024, int(1.5 * vmem_bytes) + (2 << 20)))

    cost = pl.CostEstimate(
        flops=2 * B_pad * n_in_pad * n_out + 8 * B_pad * n_out * G,
        transcendentals=B_pad * G * n_j,
        bytes_accessed=(n_j * B_pad * n_in_pad * x_it    # x re-streamed per n_out tile
                        + n_i * n_in_pad * n_out * 2     # w^T re-streamed per batch tile
                        + B_pad * n_out * o_it),
    )

    out = pl.pallas_call(
        partial(_fused_linear_gn_relu_kernel, act=act),
        out_shape=jax.ShapeDtypeStruct((B_pad, n_out), out_dtype),
        grid_spec=pltpu.PrefetchScalarGridSpec(
            num_scalar_prefetch=0,
            grid=grid,
            in_specs=[
                pl.BlockSpec((tb, tk), lambda i, j, k: (i, k)),   # x tile (native dtype)
                pl.BlockSpec((tk, tn), lambda i, j, k: (k, j)),   # w^T tile (bf16)
                pl.BlockSpec((tn, G), lambda i, j, k: (j, 0)),    # gmat (scaled)
                pl.BlockSpec((G, tn), lambda i, j, k: (0, j)),    # gmat^T * gamma
                pl.BlockSpec((1, tn), lambda i, j, k: (0, j)),    # beta
            ],
            out_specs=pl.BlockSpec((tb, tn), lambda i, j, k: (i, j)),
            scratch_shapes=[pltpu.VMEM((tb, tn), jnp.float32)],   # f32 accumulator
        ),
        compiler_params=pltpu.CompilerParams(
            dimension_semantics=("parallel", "parallel", "arbitrary"),
            vmem_limit_bytes=vmem_limit,
        ),
        cost_estimate=cost,
    )(x, w_t, gmat_scaled, gmat_t_gamma, beta_row)

    if pad_b:
        out = out[:B]
    return out


def reference(x, weight, gamma, beta, *, ng=32, act=True):
    """Pure-JAX reference mirroring PyTorch semantics (f32 math)."""
    n_out = weight.shape[0]
    groups = gcd(ng, n_out)
    y = x.astype(jnp.float32) @ weight.T.astype(jnp.float32)     # (B, n_out)
    B = y.shape[0]
    yg = y.reshape(B, groups, n_out // groups)
    mean = yg.mean(axis=-1, keepdims=True)
    var = yg.var(axis=-1, keepdims=True)
    yn = ((yg - mean) / jnp.sqrt(var + EPS)).reshape(B, n_out)
    out = yn * gamma[None, :] + beta[None, :]
    if act:
        out = jnp.maximum(out, 0.0)
    return out


if __name__ == "__main__":
    # Small deterministic setup: n_in=16, n_out=32, ng=8 -> gcd(8,32)=8 groups of 4.
    n_in, n_out, ng, batch = 16, 32, 8, 8
    key = jax.random.PRNGKey(0)
    kx, kw, kg, kb = jax.random.split(key, 4)

    x = jax.random.normal(kx, (batch, n_in), dtype=jnp.float32)
    weight = jax.random.normal(kw, (n_out, n_in), dtype=jnp.float32) * 0.1  # Linear weight (no bias)
    gamma = 1.0 + 0.1 * jax.random.normal(kg, (n_out,), dtype=jnp.float32)  # GN affine weight
    beta = 0.1 * jax.random.normal(kb, (n_out,), dtype=jnp.float32)         # GN affine bias

    w_t, gmat_scaled, gmat_t_gamma, beta_row, _ = prepare_params(weight, gamma, beta, ng=ng)

    # Reference with the same bf16 rounding applied to the MXU operands.
    x_b = x.astype(jnp.bfloat16).astype(jnp.float32)
    w_b = weight.astype(jnp.bfloat16).astype(jnp.float32)
    ref = reference(x_b, w_b, gamma, beta, ng=ng, act=True)

    # f32 output path (tight tolerance).
    out_f32 = linear_gn_relu(x, w_t, gmat_scaled, gmat_t_gamma, beta_row,
                             act=True, out_dtype=jnp.float32)
    out_f32 = jax.block_until_ready(out_f32)
    assert out_f32.shape == (batch, n_out)
    assert jnp.allclose(out_f32, ref, atol=2e-3, rtol=2e-3), "f32 output mismatch vs reference"

    # Default bf16 output path (looser tolerance due to output quantization).
    out_bf16 = linear_gn_relu(x, w_t, gmat_scaled, gmat_t_gamma, beta_row, act=True)
    out_bf16 = jax.block_until_ready(out_bf16)
    assert out_bf16.dtype == jnp.bfloat16
    assert jnp.allclose(out_bf16.astype(jnp.float32), ref, atol=3e-2, rtol=3e-2), \
        "bf16 output mismatch vs reference"

    print("KERNEL_OK")
</pallas_src>

<mosaic_0001>
module attributes {stable_mosaic.version = 11 : i64} {
  func.func @_fused_linear_gn_relu_kernel(%arg0: i32, %arg1: i32, %arg2: i32, %arg3: memref<8x128xf32, #tpu.memory_space<vmem>>, %arg4: memref<128x32xbf16, #tpu.memory_space<vmem>>, %arg5: memref<32x8xf32, #tpu.memory_space<vmem>>, %arg6: memref<8x32xf32, #tpu.memory_space<vmem>>, %arg7: memref<1x32xf32, #tpu.memory_space<vmem>>, %arg8: memref<8x32xf32, #tpu.memory_space<vmem>>, %arg9: memref<8x32xf32, #tpu.memory_space<vmem>>) attributes {dimension_semantics = [#tpu.dimension_semantics<parallel>, #tpu.dimension_semantics<parallel>, #tpu.dimension_semantics<arbitrary>], iteration_bounds = array<i64: 1, 1, 1>, scalar_prefetch = 0 : i64, scratch_operands = 1 : i64, tpu.core_type = #tpu.core_type<tc>, window_params = [{transform_indices = @transform_0, window_bounds = array<i64: 8, 128>}, {transform_indices = @transform_1, window_bounds = array<i64: 128, 32>}, {transform_indices = @transform_2, window_bounds = array<i64: 32, 8>}, {transform_indices = @transform_3, window_bounds = array<i64: 8, 32>}, {transform_indices = @transform_4, window_bounds = array<i64: 1, 32>}, {transform_indices = @transform_5, window_bounds = array<i64: 8, 32>}]} {
    %c0 = arith.constant 0 : index
    %c0_0 = arith.constant 0 : index
    %0 = vector.load %arg3[%c0, %c0_0] : memref<8x128xf32, #tpu.memory_space<vmem>>, vector<8x128xf32>
    %1 = arith.truncf %0 : vector<8x128xf32> to vector<8x128xbf16>
    %c0_1 = arith.constant 0 : index
    %c0_2 = arith.constant 0 : index
    %2 = vector.load %arg4[%c0_1, %c0_2] : memref<128x32xbf16, #tpu.memory_space<vmem>>, vector<128x32xbf16>
    %cst = arith.constant dense<0.000000e+00> : vector<8x32xf32>
    %3 = tpu.matmul %1, %2, %cst {dimension_numbers = #tpu.dot_dimension_numbers<[1], [0], [0], [1], [0, 0, 1, 1], [], []>} : vector<8x128xbf16>, vector<128x32xbf16>, vector<8x32xf32> -> vector<8x32xf32>
    %c0_i32 = arith.constant 0 : i32
    %4 = arith.cmpi eq, %arg2, %c0_i32 : i32
    %5 = arith.extui %4 : i1 to i32
    %c0_i32_3 = arith.constant 0 : i32
    %6 = arith.cmpi ne, %5, %c0_i32_3 : i32
    scf.if %6 {
      %c0_8 = arith.constant 0 : index
      %c0_9 = arith.constant 0 : index
      %13 = vector.load %arg9[%c0_8, %c0_9] : memref<8x32xf32, #tpu.memory_space<vmem>>, vector<8x32xf32>
      tpu.vector_store %arg9[%c0_8, %c0_9], %3 {strides = array<i32>} : memref<8x32xf32, #tpu.memory_space<vmem>>, vector<8x32xf32>,
    } else {
    }
    %c0_i32_4 = arith.constant 0 : i32
    %7 = arith.cmpi ne, %arg2, %c0_i32_4 : i32
    %8 = arith.extui %7 : i1 to i32
    %c0_i32_5 = arith.constant 0 : i32
    %9 = arith.cmpi ne, %8, %c0_i32_5 : i32
    scf.if %9 {
      %c0_8 = arith.constant 0 : index
      %c0_9 = arith.constant 0 : index
      %13 = vector.load %arg9[%c0_8, %c0_9] : memref<8x32xf32, #tpu.memory_space<vmem>>, vector<8x32xf32>
      %14 = arith.addf %13, %3 : vector<8x32xf32>
      %c0_10 = arith.constant 0 : index
      %c0_11 = arith.constant 0 : index
      %15 = vector.load %arg9[%c0_10, %c0_11] : memref<8x32xf32, #tpu.memory_space<vmem>>, vector<8x32xf32>
      tpu.vector_store %arg9[%c0_10, %c0_11], %14 {strides = array<i32>} : memref<8x32xf32, #tpu.memory_space<vmem>>, vector<8x32xf32>,
    } else {
    }
    %c0_i32_6 = arith.constant 0 : i32
    %10 = arith.cmpi eq, %arg2, %c0_i32_6 : i32
    %11 = arith.extui %10 : i1 to i32
    %c0_i32_7 = arith.constant 0 : i32
    %12 = arith.cmpi ne, %11, %c0_i32_7 : i32
    scf.if %12 {
      %c0_8 = arith.constant 0 : index
      %c0_9 = arith.constant 0 : index
      %13 = vector.load %arg9[%c0_8, %c0_9] : memref<8x32xf32, #tpu.memory_space<vmem>>, vector<8x32xf32>
      %c0_10 = arith.constant 0 : index
      %c0_11 = arith.constant 0 : index
      %14 = vector.load %arg5[%c0_10, %c0_11] : memref<32x8xf32, #tpu.memory_space<vmem>>, vector<32x8xf32>
      %cst_12 = arith.constant dense<0.000000e+00> : vector<8x8xf32>
      %15 = tpu.matmul %13, %14, %cst_12 {dimension_numbers = #tpu.dot_dimension_numbers<[1], [0], [0], [1], [0, 0, 1, 1], [], []>} : vector<8x32xf32>, vector<32x8xf32>, vector<8x8xf32> -> vector<8x8xf32>
      %16 = arith.mulf %13, %13 : vector<8x32xf32>
      %cst_13 = arith.constant dense<0.000000e+00> : vector<8x8xf32>
      %17 = tpu.matmul %16, %14, %cst_13 {dimension_numbers = #tpu.dot_dimension_numbers<[1], [0], [0], [1], [0, 0, 1, 1], [], []>} : vector<8x32xf32>, vector<32x8xf32>, vector<8x8xf32> -> vector<8x8xf32>
      %18 = arith.mulf %15, %15 : vector<8x8xf32>
      %19 = arith.subf %17, %18 : vector<8x8xf32>
      %cst_14 = arith.constant 0.000000e+00 : f32
      %20 = vector.broadcast %cst_14 : f32 to vector<8x8xf32>
      %21 = arith.maximumf %19, %20 : vector<8x8xf32>
      %cst_15 = arith.constant 9.99999974E-6 : f32
      %22 = vector.broadcast %cst_15 : f32 to vector<8x8xf32>
      %23 = arith.addf %21, %22 : vector<8x8xf32>
      %24 = math.rsqrt %23 : vector<8x8xf32>
      %25 = arith.mulf %15, %24 : vector<8x8xf32>
      %26 = tpu.concatenate %24, %25 in 0 : vector<8x8xf32>, vector<8x8xf32> -> vector<16x8xf32>
      %c0_16 = arith.constant 0 : index
      %c0_17 = arith.constant 0 : index
      %27 = vector.load %arg6[%c0_16, %c0_17] : memref<8x32xf32, #tpu.memory_space<vmem>>, vector<8x32xf32>
      %cst_18 = arith.constant dense<0.000000e+00> : vector<16x32xf32>
      %28 = tpu.matmul %26, %27, %cst_18 {dimension_numbers = #tpu.dot_dimension_numbers<[1], [0], [0], [1], [0, 0, 1, 1], [], []>} : vector<16x8xf32>, vector<8x32xf32>, vector<16x32xf32> -> vector<16x32xf32>
      %29 = vector.extract_strided_slice %28 {offsets = [0, 0], sizes = [8, 32], strides = [1, 1]} : vector<16x32xf32> to vector<8x32xf32>
      %c0_19 = arith.constant 0 : index
      %c0_20 = arith.constant 0 : index
      %30 = vector.load %arg7[%c0_19, %c0_20] : memref<1x32xf32, #tpu.memory_space<vmem>>, vector<1x32xf32>
      %31 = vector.extract_strided_slice %28 {offsets = [8, 0], sizes = [8, 32], strides = [1, 1]} : vector<16x32xf32> to vector<8x32xf32>
      %32 = vector.broadcast %30 : vector<1x32xf32> to vector<8x32xf32>
      %33 = arith.subf %32, %31 : vector<8x32xf32>
      %34 = arith.mulf %13, %29 : vector<8x32xf32>
      %35 = arith.addf %34, %33 : vector<8x32xf32>
      %cst_21 = arith.constant 0.000000e+00 : f32
      %36 = vector.broadcast %cst_21 : f32 to vector<8x32xf32>
      %37 = arith.maximumf %35, %36 : vector<8x32xf32>
      %c0_22 = arith.constant 0 : index
      %c0_23 = arith.constant 0 : index
      %38 = vector.load %arg8[%c0_22, %c0_23] : memref<8x32xf32, #tpu.memory_space<vmem>>, vector<8x32xf32>
      tpu.vector_store %arg8[%c0_22, %c0_23], %37 {strides = array<i32>} : memref<8x32xf32, #tpu.memory_space<vmem>>, vector<8x32xf32>,
    } else {
    }
    return
  }
  func.func @transform_0(%arg0: i32, %arg1: i32, %arg2: i32) -> (i32, i32) {
    %c0_i32 = arith.constant 0 : i32
    return %arg0, %arg2 : i32, i32
  }
  func.func @transform_1(%arg0: i32, %arg1: i32, %arg2: i32) -> (i32, i32) {
    %c0_i32 = arith.constant 0 : i32
    return %arg2, %arg1 : i32, i32
  }
  func.func @transform_2(%arg0: i32, %arg1: i32, %arg2: i32) -> (i32, i32) {
    %c0_i32 = arith.constant 0 : i32
    %c0_i32_0 = arith.constant 0 : i32
    return %arg1, %c0_i32 : i32, i32
  }
  func.func @transform_3(%arg0: i32, %arg1: i32, %arg2: i32) -> (i32, i32) {
    %c0_i32 = arith.constant 0 : i32
    %c0_i32_0 = arith.constant 0 : i32
    return %c0_i32, %arg1 : i32, i32
  }
  func.func @transform_4(%arg0: i32, %arg1: i32, %arg2: i32) -> (i32, i32) {
    %c0_i32 = arith.constant 0 : i32
    %c0_i32_0 = arith.constant 0 : i32
    return %c0_i32, %arg1 : i32, i32
  }
  func.func @transform_5(%arg0: i32, %arg1: i32, %arg2: i32) -> (i32, i32) {
    %c0_i32 = arith.constant 0 : i32
    return %arg0, %arg1 : i32, i32
  }
}

</mosaic_0001>

<bundles_post_ra>
// kernel: tpu_custom_call.1
= control target key start
LH: loop header
LB: loop body
LE: loop exit
PB: predicated region body
PF: predicated region fallthrough
CT: control target
= control target key end

     0   :  { %v530_v1 = vmov 0.0   ;;  %vm531_vm0 = vmmov 0   ;;  %s618_s0 = inlined_call_operand.vmem [shape: f32[8,128], index: 0, kind: input, shape index: {}]   ;;  %s619_s1 = inlined_call_operand.vmem [shape: bf16[128,32], index: 1, kind: input, shape index: {}]   ;;  %s620_s2 = inlined_call_operand.vmem [shape: f32[32,8], index: 2, kind: input, shape index: {}]   ;;  %s621_s3 = inlined_call_operand.vmem [shape: f32[8,32], index: 3, kind: input, shape index: {}]   ;;  %s622_s4 = inlined_call_operand.vmem [shape: f32[1,32], index: 4, kind: input, shape index: {}]   ;;  %s623_s5 = inlined_call_operand.hbm [shape: f32[8,32], index: 5, kind: output, shape index: {}]  }
   0x1   :  { %v498_v0 = vld [vmem:[%s619_s1 + $0x38] sm:$0xff]   ;;  %448 = vmatprep.subr.bf16.mxu0 %v530_v1  ;;  %468 = vmatprep.subr.mxu1 %v530_v1  ;;  %v499_v2 = vld [vmem:[%s619_s1 + $0x30] sm:$0xff]   ;;  %v500_v3 = vld [vmem:[%s619_s1 + $0x28] sm:$0xff]  }
   0x2   :  { %449 = vmatpush3.bf16.msra.mxu0 %v498_v0  ;;  %464 = vmatprep.mubr.msk.bf16.mxu0 %vm531_vm0, %v530_v1 }
   0x3   :  { %450 = vmatprep.subr.bf16.mxu0 %v530_v1  ;;  %476 = vmatprep.mubr.msk.f32.mxu1 %vm531_vm0, %v530_v1 }
   0x6   :  { %451 = vmatpush3.bf16.msra.mxu0 %v499_v2 }
   0x7   :  { %452 = vmatprep.subr.bf16.mxu0 %v530_v1 }
   0x8   :  { %10 = vsyncpa [#allocation4], 0  ;;  %v501_v4 = vld [vmem:[%s619_s1 + $0x20] sm:$0xff]   ;;  %v502_v5 = vld [vmem:[%s619_s1 + $0x18] sm:$0xff]   ;;  %vm132_vm1 = vcmask 261120   ;;  %vm305_vm2 = vcmask 64512  }
   0x9   :  { %v503_v6 = vld [vmem:[%s619_s1 + $0x10] sm:$0xff]   ;;  %v504_v7 = vld [vmem:[%s619_s1 + $0x8] sm:$0xff]   ;;  %v505_v8 = vld [vmem:[%s619_s1] sm:$0xff]  }
   0xa   :  { %453 = vmatpush3.bf16.msra.mxu0 %v500_v3  ;;  %v22_v9 = vld [vmem:[%s618_s0] sm:$0xff]  ;;  %v149_v11 = vld [vmem:[%s620_s2 + $0x18] sm:$0xff]  ;;  %v148_v12 = vld [vmem:[%s620_s2 + $0x10] sm:$0xff] }
   0xb   :  { %454 = vmatprep.subr.bf16.mxu0 %v530_v1  ;;  %v23_v10 = vpack.c.bf16 %v22_v9, %v22_v9  ;;  %469 = vmatpush3.msra.mxu1 %v149_v11  ;;  %v147_v13 = vld [vmem:[%s620_s2 + $0x8] sm:$0xff]  ;;  %v146_v14 = vld [vmem:[%s620_s2] sm:$0xff] }
   0xc   :  { %470 = vmatprep.subr.mxu1 %v530_v1  ;;  %v304_v21 = vld [vmem:[%s621_s3] sm:$0xff]  ;;  %s532_s3 = smov [#allocation3]  }
   0xd   :  { %471 = vmatpush3.msra.mxu1 %v148_v12  ;;  %v425_v33 = vld [vmem:[%s622_s4] ss:$0 sm:$0xff]  ;;  %s405_s20 = sshll.u32 %s532_s3, 4  ;;  %s406_s20 = int_to_ptr.vmem [resolvable:$true] %s405_s20 }
   0xe   :  { %455 = vmatpush3.bf16.msra.mxu0 %v501_v4  ;;  %472 = vmatprep.subr.mxu1 %v530_v1  ;;  %s508_s21 = scalar_lea.vmem %s406_s20, 128  ;;  %p513_p1 = scmp.lt.s32.totalorder %s406_s20, %s406_s20 }
   0xf   :  { %456 = vmatprep.subr.bf16.mxu0 %v530_v1  ;;  %473 = vmatpush3.msra.mxu1 %v147_v13  ;;  %p509_p0 = scmp.ne.s32.totalorder %s406_s20, %s508_s21  ;;  %p514_p2 = scmp.lt.s32.totalorder %s508_s21, %s508_s21 }
  0x10   :  { %474 = vmatprep.subr.mxu1 %v530_v1 }
  0x11   :  { %475 = vmatpush3.msra.mxu1 %v146_v14  ;;  %p515_p3 = por %p514_p2, %p513_p1 }
  0x12   :  { %457 = vmatpush3.bf16.msra.mxu0 %v502_v5  ;;  %479 = vmatprep.subr.mxu1 %v530_v1 }
  0x13   :  { %458 = vmatprep.subr.bf16.mxu0 %v530_v1  ;;  %p516_p4 = pnand %p515_p3, %p509_p0 }
  0x16   :  { %459 = vmatpush3.bf16.msra.mxu0 %v503_v6 }
  0x17   :  { %460 = vmatprep.subr.bf16.mxu0 %v530_v1 }
  0x1a   :  { %461 = vmatpush3.bf16.msra.mxu0 %v504_v7 }
  0x1b   :  { %462 = vmatprep.subr.bf16.mxu0 %v530_v1 }
  0x1e   :  { %463 = vmatpush3.bf16.msra.mxu0 %v505_v8 }
  0x21   :  { %465 = vmatmul.mubr.bf16.vlgmr.msra.gmra.mxu0 %v23_v10 }
  0xe1   :  { %v122_v15 = vpop.f32.mrf.mxu0 }
  0xe2   :  { %133 = vst.msk [vmem:[#allocation2] sm:$0xff] %vm132_vm1, %v122_v15 }
  0xe3   :  { %v466_v16 = vpop.f32.mrf.mxu0 }
  0xe5   :  { %v125_v17 = vpop.f32.mrf.mxu0 }
  0xe7   :  { %v467_v18 = vpop.f32.mrf.mxu0 }
  0xe9   :  { %v145_v19 = vld [vmem:[#allocation2] sm:$0xff] }
  0xea   :  { %477 = vmatmul.mubr.msk.f32.vlgmr.msra.gmra.mxu1 %vm132_vm1, %v145_v19  ;;  %v224_v20 = vmul.f32 %v145_v19, %v145_v19 }
  0xeb   :  { %480 = vmatpush3.msra.mxu1 %v149_v11  ;;  %487 = vmatprep.mubr.msk.f32.mxu1 %vm531_vm0, %v530_v1 }
  0xec   :  { %481 = vmatprep.subr.mxu1 %v530_v1 }
  0xed   :  { %482 = vmatpush3.msra.mxu1 %v148_v12 }
  0xee   :  { %483 = vmatprep.subr.mxu1 %v530_v1 }
  0xef   :  { %484 = vmatpush3.msra.mxu1 %v147_v13 }
  0xf0   :  { %485 = vmatprep.subr.mxu1 %v530_v1 }
  0xf1   :  { %486 = vmatpush3.msra.mxu1 %v146_v14 }
  0xf2   :  { %488 = vmatmul.mubr.msk.f32.vlgmr.msra.gmra.mxu1 %vm132_vm1, %v224_v20  ;;  %490 = vmatprep.subr.mxu1 %v304_v21 }
  0xf3   :  { %491 = vmatpush3.msra.mxu1 %v304_v21 }
 0x1aa   :  { %v220_v22 = vpop.f32.mrf.mxu1 }
 0x1ab   :  { %v298_v24 = vmul.f32 %v220_v22, %v220_v22 }
 0x1ac   :  { %v478_v23 = vpop.f32.mrf.mxu1 }
 0x1b2   :  { %v294_v25 = vpop.f32.mrf.mxu1 }
 0x1b3   :  { %v299_v26 = vsub.f32 %v294_v25, %v298_v24 }
 0x1b4   :  { %v489_v27 = vpop.f32.mrf.mxu1 }
 0x1b5   :  { %v300_v28 = vmax.f32 %v299_v26, 0.0 }
 0x1b7   :  { %v301_v29 = vadd.f32 1e-05, %v300_v28 }
 0x1b9   :  { %506 = vrsqrt.f32 %v301_v29 }
 0x1c6   :  { %v507_v30 = vpop.eup %506 }
 0x1c7   :  { %492 = vmatprep.mubr.msk.f32.mxu1 %vm305_vm2, %v507_v30  ;;  %v303_v31 = vmul.f32 %v507_v30, %v220_v22 }
 0x1c9   :  { %493 = vmatmul.mubr.msk.f32.vlgmr.msra.gmra.mxu1 %vm305_vm2, %v303_v31 }
 0x289   :  { %v494_v32 = vpop.f32.mrf.mxu1 }
 0x28a   :  { %v394_v35 = vsub.f32 %v425_v33, %v494_v32 }
 0x28b   :  { %v378_v34 = vpop.f32.mrf.mxu1 }
 0x28c   :  { %v395_v36 = vmul.f32 %v378_v34, %v145_v19 }
 0x28e   :  { %v396_v37 = vadd.f32 %v395_v36, %v394_v35 }
 0x290   :  { %v397_v38 = vmax.f32 %v396_v37, 0.0 }
 0x292   :  { %398 = vst.msk [vmem:[#allocation3] sm:$0xff] %vm132_vm1, %v397_v38 }
 0x293   :  { %519 = shalt.err (!%p516_p4)
}
 0x294   :  { %408 = dma.vmem_to_hbm [thread:$0]  %s406_s20, 128, %s623_s5, [#allocation4]  }
 0x295   :  { %528 = dma.done.wait [#allocation4], 128  }
 0x296   :  { %529 = vsyncadd [#allocation4], 4294967168 }
 0x297   :  { %412 = vsyncpa [#allocation4], 1 }

</bundles_post_ra>
